<compile_context>
chip_gen: v7x
topology: tpu7x:2x2x1
jax: 0.10.0
libtpu: 0.0.40
codegen_flags: <defaults>
</compile_context>

<pallas_src>
import functools
import math

import jax
import jax.numpy as jnp
from jax.experimental import pallas as pl
from jax.experimental.pallas import tpu as pltpu

H1, H2 = 20, 10  # hidden widths fixed by the Actor module


def _round_up(x, m):
    return ((x + m - 1) // m) * m


def actor_kernel(xt_ref, p_ref, o_ref, *, in_size, act_size, bias_col):
    # Feature-major layout: xt_ref is (in_size, TB) bf16, batch in lanes.
    xt = xt_ref[...]                                                  # (in, TB) bf16

    # Static ref slices of the VMEM-resident packed parameter slab (no full
    # slab load; slices are cheap and tiny).
    w1t = p_ref[0:H1, 0:in_size].astype(jnp.bfloat16)                 # (20, in)
    w2t = p_ref[H1:H1 + H2, 0:H1].astype(jnp.bfloat16)                # (10, 20)
    w3t = p_ref[H1 + H2:H1 + H2 + act_size, 0:H2].astype(jnp.bfloat16)  # (A, 10)
    b1 = p_ref[0:H1, bias_col:bias_col + 1]                           # (20, 1) f32
    b2 = p_ref[H1:H1 + H2, bias_col:bias_col + 1]                     # (10, 1) f32
    b3 = p_ref[H1 + H2:H1 + H2 + act_size, bias_col:bias_col + 1]     # (A, 1)  f32

    # MXU matmuls: bf16 operands, f32 accumulation; bias/ReLU/softmax in f32.
    h1 = jnp.maximum(
        jnp.dot(w1t, xt, preferred_element_type=jnp.float32) + b1, 0.0)
    h2 = jnp.maximum(
        jnp.dot(w2t, h1.astype(jnp.bfloat16),
                preferred_element_type=jnp.float32) + b2, 0.0)
    logits = jnp.dot(w3t, h2.astype(jnp.bfloat16),
                     preferred_element_type=jnp.float32) + b3         # (A, TB)

    # Numerically stable softmax over the tiny feature axis (sublanes).
    # Exact division so every column sums to 1 to f32 precision.
    m = jnp.max(logits, axis=0, keepdims=True)
    e = jnp.exp(logits - m)
    denom = jnp.sum(e, axis=0, keepdims=True)
    o_ref[...] = (e / denom).astype(o_ref.dtype)


def pack_actor_params(params):
    """Pack w1,b1,w2,b2,w3,b3 into one f32 slab in transposed (feature-major) form.

    Slab shape (R, C) with R = 20 + 10 + action_size, C = max(input_size, 20, 10) + 1:
      rows  0..19          , cols 0..in-1 : W1^T [20, in]
      rows 20..29          , cols 0..19   : W2^T [10, 20]
      rows 30..30+A-1      , cols 0..9    : W3^T [A, 10]
      column C-1                           : biases b1 | b2 | b3 stacked by row block
    """
    w1, w2, w3 = params["w1"], params["w2"], params["w3"]   # [in,20],[20,10],[10,A]
    b1, b2, b3 = params["b1"], params["b2"], params["b3"]
    in_size = w1.shape[0]
    act_size = w3.shape[1]
    rows = H1 + H2 + act_size
    cols = max(in_size, H1, H2) + 1
    p = jnp.zeros((rows, cols), jnp.float32)
    p = p.at[0:H1, 0:in_size].set(w1.T)
    p = p.at[H1:H1 + H2, 0:H1].set(w2.T)
    p = p.at[H1 + H2:rows, 0:H2].set(w3.T)
    p = p.at[0:H1, cols - 1].set(b1.reshape(-1))
    p = p.at[H1:H1 + H2, cols - 1].set(b2.reshape(-1))
    p = p.at[H1 + H2:rows, cols - 1].set(b3.reshape(-1))
    return p


def actor_forward(state, packed, tb=4096):
    """state: [B, input_size] f32.  packed: output of pack_actor_params."""
    B, in_size = state.shape
    R, C = packed.shape
    act_size = R - (H1 + H2)

    # Lane (batch) tile: either the whole batch in one block (legal for any B:
    # it equals the full array dim) or a multiple-of-128 tile <= B with the
    # ragged tail handled by Pallas masking (no jnp.pad / extra HBM pass).
    tb = max(128, _round_up(tb, 128))
    TB = B if B <= tb else tb
    grid = (pl.cdiv(B, TB),)

    # Feature-major, bf16 input: batch lands in the lane dimension and the
    # per-step x DMA / VMEM footprint is halved.
    xt = state.astype(jnp.bfloat16).T                        # (in_size, B)

    kernel = functools.partial(
        actor_kernel, in_size=in_size, act_size=act_size, bias_col=C - 1)

    out_t = pl.pallas_call(
        kernel,
        out_shape=jax.ShapeDtypeStruct((act_size, B), jnp.float32),
        grid=grid,
        in_specs=[
            pl.BlockSpec((in_size, TB), lambda i: (0, i)),   # per-step x tile
            pl.BlockSpec((R, C), lambda i: (0, 0)),          # resident params
        ],
        out_specs=pl.BlockSpec((act_size, TB), lambda i: (0, i)),
        compiler_params=pltpu.CompilerParams(
            dimension_semantics=("parallel",)),
    )(xt, packed)

    return out_t.T                                           # (B, act_size)


def xavier_uniform(key, fan_in, fan_out, dtype=jnp.float32):
    # matches torch.nn.init.xavier_uniform_ (gain=1); stored [in, out] so the
    # forward computes x @ W (== x @ W_pt.T for PyTorch's [out, in] weight).
    limit = math.sqrt(6.0 / (fan_in + fan_out))
    return jax.random.uniform(key, (fan_in, fan_out), dtype, -limit, limit)


def init_actor_params(key, input_size, action_size):
    k1, k2, k3 = jax.random.split(key, 3)
    return {
        "w1": xavier_uniform(k1, input_size, H1),
        "b1": jnp.zeros((H1,), jnp.float32),
        "w2": xavier_uniform(k2, H1, H2),
        "b2": jnp.zeros((H2,), jnp.float32),
        "w3": xavier_uniform(k3, H2, action_size),
        "b3": jnp.zeros((action_size,), jnp.float32),
    }


def actor_reference(state, params):
    h1 = jnp.maximum(state @ params["w1"] + params["b1"], 0.0)
    h2 = jnp.maximum(h1 @ params["w2"] + params["b2"], 0.0)
    logits = h2 @ params["w3"] + params["b3"]
    return jax.nn.softmax(logits, axis=-1)


if __name__ == "__main__":
    input_size = 32
    action_size = 4

    key = jax.random.PRNGKey(0)
    kp, kx1, kx2 = jax.random.split(key, 3)
    params = init_actor_params(kp, input_size, action_size)
    packed = pack_actor_params(params)  # packed once, reused for every call

    actor_apply = jax.jit(actor_forward, static_argnames=("tb",))

    # Small batch (single grid step): block equals the full batch dim.
    state = jax.random.normal(kx1, (8, input_size), jnp.float32)
    probs = jax.block_until_ready(actor_apply(state, packed))
    ref = actor_reference(state, params)
    assert probs.shape == (8, action_size)
    # Exact-division softmax: rows sum to 1 to f32 precision.
    assert bool(jnp.allclose(jnp.sum(probs, axis=-1), 1.0, atol=1e-4))
    # bf16 matmul operands with f32 accumulation vs. the f32 reference.
    assert bool(jnp.allclose(probs, ref, atol=1e-2, rtol=1e-2))

    # Non-multiple batch with a 128-lane tile: exercises the cdiv grid
    # (3 steps) and the masked ragged-tail block (no jnp.pad).
    state2 = jax.random.normal(kx2, (300, input_size), jnp.float32)
    probs2 = jax.block_until_ready(actor_apply(state2, packed, tb=128))
    ref2 = actor_reference(state2, params)
    assert probs2.shape == (300, action_size)
    assert bool(jnp.allclose(jnp.sum(probs2, axis=-1), 1.0, atol=1e-4))
    assert bool(jnp.allclose(probs2, ref2, atol=1e-2, rtol=1e-2))

    print("KERNEL_OK")
</pallas_src>

<mosaic_0001>
module attributes {stable_mosaic.version = 11 : i64} {
  func.func @actor_kernel(%arg0: i32, %arg1: memref<32x8xbf16, #tpu.memory_space<vmem>>, %arg2: memref<34x33xf32, #tpu.memory_space<vmem>>, %arg3: memref<4x8xf32, #tpu.memory_space<vmem>>) attributes {dimension_semantics = [#tpu.dimension_semantics<parallel>], iteration_bounds = array<i64: 1>, scalar_prefetch = 0 : i64, scratch_operands = 0 : i64, tpu.core_type = #tpu.core_type<tc>, window_params = [{transform_indices = @transform_0, window_bounds = array<i64: 32, 8>}, {pipeline_mode = #tpu.pipeline_mode<synchronous>, transform_indices = @transform_1, window_bounds = array<i64: 34, 33>}, {transform_indices = @transform_2, window_bounds = array<i64: 4, 8>}]} {
    %c0 = arith.constant 0 : index
    %c0_0 = arith.constant 0 : index
    %0 = vector.load %arg1[%c0, %c0_0] : memref<32x8xbf16, #tpu.memory_space<vmem>>, vector<32x8xbf16>
    %c0_1 = arith.constant 0 : index
    %c0_2 = arith.constant 0 : index
    %1 = vector.load %arg2[%c0_1, %c0_2] : memref<34x33xf32, #tpu.memory_space<vmem>>, vector<20x32xf32>
    %2 = arith.truncf %1 : vector<20x32xf32> to vector<20x32xbf16>
    %c20 = arith.constant 20 : index
    %c0_3 = arith.constant 0 : index
    %3 = vector.load %arg2[%c20, %c0_3] : memref<34x33xf32, #tpu.memory_space<vmem>>, vector<10x20xf32>
    %4 = arith.truncf %3 : vector<10x20xf32> to vector<10x20xbf16>
    %c30 = arith.constant 30 : index
    %c0_4 = arith.constant 0 : index
    %5 = vector.load %arg2[%c30, %c0_4] : memref<34x33xf32, #tpu.memory_space<vmem>>, vector<4x10xf32>
    %6 = arith.truncf %5 : vector<4x10xf32> to vector<4x10xbf16>
    %c0_5 = arith.constant 0 : index
    %c32 = arith.constant 32 : index
    %7 = vector.load %arg2[%c0_5, %c32] : memref<34x33xf32, #tpu.memory_space<vmem>>, vector<20x1xf32>
    %c20_6 = arith.constant 20 : index
    %c32_7 = arith.constant 32 : index
    %8 = vector.load %arg2[%c20_6, %c32_7] : memref<34x33xf32, #tpu.memory_space<vmem>>, vector<10x1xf32>
    %c30_8 = arith.constant 30 : index
    %c32_9 = arith.constant 32 : index
    %9 = vector.load %arg2[%c30_8, %c32_9] : memref<34x33xf32, #tpu.memory_space<vmem>>, vector<4x1xf32>
    %cst = arith.constant dense<0.000000e+00> : vector<20x8xf32>
    %10 = tpu.matmul %2, %0, %cst {dimension_numbers = #tpu.dot_dimension_numbers<[1], [0], [0], [1], [0, 0, 1, 1], [], []>} : vector<20x32xbf16>, vector<32x8xbf16>, vector<20x8xf32> -> vector<20x8xf32>
    %11 = vector.broadcast %7 : vector<20x1xf32> to vector<20x8xf32>
    %12 = arith.addf %10, %11 : vector<20x8xf32>
    %cst_10 = arith.constant 0.000000e+00 : f32
    %13 = vector.broadcast %cst_10 : f32 to vector<20x8xf32>
    %14 = arith.maximumf %12, %13 : vector<20x8xf32>
    %15 = arith.truncf %14 : vector<20x8xf32> to vector<20x8xbf16>
    %cst_11 = arith.constant dense<0.000000e+00> : vector<10x8xf32>
    %16 = tpu.matmul %4, %15, %cst_11 {dimension_numbers = #tpu.dot_dimension_numbers<[1], [0], [0], [1], [0, 0, 1, 1], [], []>} : vector<10x20xbf16>, vector<20x8xbf16>, vector<10x8xf32> -> vector<10x8xf32>
    %17 = vector.broadcast %8 : vector<10x1xf32> to vector<10x8xf32>
    %18 = arith.addf %16, %17 : vector<10x8xf32>
    %cst_12 = arith.constant 0.000000e+00 : f32
    %19 = vector.broadcast %cst_12 : f32 to vector<10x8xf32>
    %20 = arith.maximumf %18, %19 : vector<10x8xf32>
    %21 = arith.truncf %20 : vector<10x8xf32> to vector<10x8xbf16>
    %cst_13 = arith.constant dense<0.000000e+00> : vector<4x8xf32>
    %22 = tpu.matmul %6, %21, %cst_13 {dimension_numbers = #tpu.dot_dimension_numbers<[1], [0], [0], [1], [0, 0, 1, 1], [], []>} : vector<4x10xbf16>, vector<10x8xbf16>, vector<4x8xf32> -> vector<4x8xf32>
    %23 = vector.broadcast %9 : vector<4x1xf32> to vector<4x8xf32>
    %24 = arith.addf %22, %23 : vector<4x8xf32>
    %cst_14 = arith.constant dense<0xFF800000> : vector<8xf32>
    %25 = vector.multi_reduction <maximumf>, %24, %cst_14 [0] : vector<4x8xf32> to vector<8xf32>
    %26 = vector.shape_cast %25 : vector<8xf32> to vector<1x8xf32>
    %27 = vector.broadcast %26 : vector<1x8xf32> to vector<4x8xf32>
    %28 = arith.subf %24, %27 : vector<4x8xf32>
    %29 = math.exp %28 : vector<4x8xf32>
    %cst_15 = arith.constant dense<0.000000e+00> : vector<8xf32>
    %30 = vector.multi_reduction <add>, %29, %cst_15 [0] : vector<4x8xf32> to vector<8xf32>
    %31 = vector.shape_cast %30 : vector<8xf32> to vector<1x8xf32>
    %32 = vector.broadcast %31 : vector<1x8xf32> to vector<4x8xf32>
    %33 = arith.divf %29, %32 : vector<4x8xf32>
    %c0_16 = arith.constant 0 : index
    %c0_17 = arith.constant 0 : index
    %34 = vector.load %arg3[%c0_16, %c0_17] : memref<4x8xf32, #tpu.memory_space<vmem>>, vector<4x8xf32>
    tpu.vector_store %arg3[%c0_16, %c0_17], %33 {strides = array<i32>} : memref<4x8xf32, #tpu.memory_space<vmem>>, vector<4x8xf32>,
    return
  }
  func.func @transform_0(%arg0: i32) -> (i32, i32) {
    %c0_i32 = arith.constant 0 : i32
    %c0_i32_0 = arith.constant 0 : i32
    return %c0_i32, %arg0 : i32, i32
  }
  func.func @transform_1(%arg0: i32) -> (i32, i32) {
    %c0_i32 = arith.constant 0 : i32
    %c0_i32_0 = arith.constant 0 : i32
    %c0_i32_1 = arith.constant 0 : i32
    return %c0_i32, %c0_i32_0 : i32, i32
  }
  func.func @transform_2(%arg0: i32) -> (i32, i32) {
    %c0_i32 = arith.constant 0 : i32
    %c0_i32_0 = arith.constant 0 : i32
    return %c0_i32, %arg0 : i32, i32
  }
}

</mosaic_0001>

<bundles_post_ra>
// kernel: actor_forward.1
= control target key start
LH: loop header
LB: loop body
LE: loop exit
PB: predicated region body
PF: predicated region fallthrough
CT: control target
= control target key end

     0   :  { %7 = vsyncpa [#allocation3], 0  ;;  %s436_s0 = inlined_call_operand.vmem [shape: bf16[32,8], index: 0, kind: input, shape index: {}]   ;;  %s437_s1 = inlined_call_operand.hbm [shape: f32[34,33], index: 1, kind: input, shape index: {}]   ;;  %s438_s2 = inlined_call_operand.hbm [shape: f32[4,8], index: 2, kind: output, shape index: {}]  }
   0x1   :  { %8 = vsyncpa [#allocation4], 0  ;;  %s379_s9 = smov [#allocation2]   ;;  %s331_s13 = scalar_lea.hbm %s437_s1, 640 }
   0x2   :  { %s16_s10 = sshll.u32 %s379_s9, 4  ;;  %p332_p0 = scmp.ne.s32.totalorder %s437_s1, %s331_s13  ;;  %s17_s10 = int_to_ptr.vmem [resolvable:$true] %s16_s10 }
   0x3   :  { %p335_p1 = scmp.lt.u32.totalorder %s331_s13, %s437_s1 }
   0x5   :  { %p337_p2 = pnand %p335_p1, %p332_p0 }
   0x7   :  { %340 = shalt.err (!%p337_p2)
}
   0x8   :  { %s341_s18 = scalar_lea.vmem %s17_s10, 640  ;;  %p346_p4 = scmp.lt.s32.totalorder %s17_s10, %s17_s10 }
   0x9   :  { %p342_p3 = scmp.ne.s32.totalorder %s17_s10, %s341_s18  ;;  %p347_p5 = scmp.lt.s32.totalorder %s341_s18, %s341_s18 }
   0xb   :  { %p348_p6 = por %p347_p5, %p346_p4 }
   0xd   :  { %p349_p7 = pnand %p348_p6, %p342_p3 }
   0xf   :  { %352 = shalt.err (!%p349_p7)
}
  0x10   :  { %s380_s19 = smov 128   ;;  %s381_s20 = smov 8  }
  0x11   :  { %22 = dma.hbm_to_vmem [thread:$0]  %s437_s1, 640, %s17_s10, [#allocation3], %s380_s19, %s380_s19, %s381_s20  }
  0x12   :  { %375 = dma.done.wait [#allocation3], 640  }
  0x13   :  { %376 = vsyncadd [#allocation3], 4294966656  ;;  %v382_v0 = vmov 32   ;;  %v325_v1 = vld [vmem:[%s436_s0] sm:$0xff]   ;;  %v326_v2 = vld [vmem:[%s436_s0 + $0x8] sm:$0xff]   ;;  %vm68_vm0 = vcmask 261120  }
  0x14   :  { %323 = vset.pattern.permute.xlu0 %v382_v0  ;;  %324 = vset.pattern.permute.xlu1 %v382_v0  ;;  %v31_v3 = vld [vmem:[#allocation2] sm:$0xff]  ;;  %v32_v4 = vld [vmem:[#allocation2 + $0x8] sm:$0xff]  ;;  %v33_v6 = vld [vmem:[#allocation2 + $0x10] sm:$0xf]  ;;  %v383_v12 = vmov 0.0   ;;  %vm384_vm1 = vmmov 0  }
  0x15   :  { %294 = vmatprep.subr.bf16.mxu0 %v325_v1  ;;  %v34_v5 = vpack.c.bf16 %v32_v4, %v31_v3  ;;  %43 = vperm.xlu0 %323, %v31_v3   ;;  %v37_v7 = vld [vmem:[#allocation2 + $0x1c] sm:$0x3]  ;;  %v36_v8 = vld [vmem:[#allocation2 + $0x14] sm:$0xff]  ;;  %v35_v10 = vpack.c.bf16 %v33_v6, %v33_v6  ;;  %v39_v11 = vld [vmem:[#allocation2 + $0x1e] sm:$0xf]  ;;  %vm142_vm2 = vcmask 1041408  }
  0x16   :  { %295 = vmatpush3.bf16.msra.mxu0 %v325_v1  ;;  %53 = vperm.xlu1 %324, %v33_v6   ;;  %v38_v9 = vpack.c.bf16 %v37_v7, %v36_v8  ;;  %vm138_vm3 = vcmask 162816   ;;  %vm199_vm4 = vcmask 1044480   ;;  %v40_v40 = vpack.c.bf16 %v39_v11, %v39_v11  ;;  %s385_s0 = smov [#allocation5]  }
  0x17   :  { %296 = vmatprep.subr.bf16.mxu0 %v326_v2  ;;  %298 = vmatprep.mubr.msk.bf16.mxu0 %vm68_vm0, %v34_v5  ;;  %vm195_vm5 = vcmask 80896   ;;  %vm243_vm6 = vcmask 60416   ;;  %s270_s1 = sshll.u32 %s385_s0, 4  ;;  %s271_s1 = int_to_ptr.vmem [resolvable:$true] %s270_s1 }
  0x18   :  { %302 = vmatprep.subr.bf16.mxu1 %v383_v12  ;;  %306 = vmatprep.mubr.msk.bf16.mxu1 %vm384_vm1, %v383_v12  ;;  %s353_s27 = scalar_lea.vmem %s271_s1, 64  ;;  %p358_p9 = scmp.lt.s32.totalorder %s271_s1, %s271_s1 }
  0x19   :  { %48 = vperm.xlu0 %323, %v32_v4   ;;  %p354_p8 = scmp.ne.s32.totalorder %s271_s1, %s353_s27  ;;  %p359_p10 = scmp.lt.s32.totalorder %s353_s27, %s353_s27 }
  0x1a   :  { %297 = vmatpush3.bf16.msra.mxu0 %v326_v2  ;;  %130 = vperm.xlu1 %324, %v36_v8  }
  0x1b   :  { %310 = vmatprep.subr.bf16.mxu0 %v383_v12  ;;  %p360_p11 = por %p359_p10, %p358_p9 }
  0x1d   :  { %299 = vmatmul.mubr.msk.bf16.vlgmr.msra.gmra.mrb[0].mxu0 %vm68_vm0, %v35_v10  ;;  %135 = vperm.xlu0 %323, %v37_v7   ;;  %p361_p12 = pnand %p360_p11, %p354_p8 }
  0x1e   :  { %192 = vperm.xlu1 %324, %v39_v11   ;;  %312 = vmatprep.mubr.msk.bf16.mxu0 %vm384_vm1, %v383_v12 }
  0x94   :  { %v44_v13 = vpop.permute.xlu0 %43 }
  0x95   :  { %v54_v14 = vpop.permute.xlu1 %53 }
  0x98   :  { %v49_v20 = vpop.permute.xlu0 %48 }
  0x99   :  { %v131_v29 = vpop.permute.xlu1 %130 }
  0x9c   :  { %v136_v33 = vpop.permute.xlu0 %135 }
  0x9d   :  { %v193_v42 = vpop.permute.xlu1 %192 }
  0xf0   :  { %v300_v15 = vpop.f32.mrb[0].mxu0 }
  0xf1   :  { %v118_v16 = vadd.f32 %v300_v15, %v54_v14  ;;  %v109_v17 = vpop.f32.mrb[1].mxu0 }
  0xf2   :  { %v110_v18 = vadd.f32 %v109_v17, %v44_v13  ;;  %v301_v19 = vpop.f32.mrb[2].mxu0 }
  0xf3   :  { %v112_v21 = vpop.f32.mrb[3].mxu0  ;;  %v125_v23 = vmax.f32 %v118_v16, 0.0 }
  0xf4   :  { %v113_v22 = vadd.f32 %v112_v21, %v49_v20  ;;  %v123_v24 = vmax.f32 %v110_v18, 0.0 }
  0xf5   :  { %v127_v27 = vpack.c.bf16 %v125_v23, %v125_v23 }
  0xf6   :  { %v124_v25 = vmax.f32 %v113_v22, 0.0 }
  0xf7   :  { %v144_v28 = vsel %vm142_vm2, %v127_v27, 0 }
  0xf8   :  { %v126_v26 = vpack.c.bf16 %v124_v25, %v123_v24 }
  0xfa   :  { %303 = vmatpush3.bf16.msra.mxu1 %v126_v26 }
  0xfb   :  { %304 = vmatprep.subr.bf16.mxu1 %v383_v12 }
  0xfe   :  { %305 = vmatpush3.bf16.msra.mxu1 %v144_v28 }
 0x101   :  { %307 = vmatmul.mubr.msk.bf16.vlgmr.msra.gmra.mrb[0].mxu1 %vm138_vm3, %v38_v9 }
 0x1d4   :  { %v180_v30 = vpop.f32.mrb[0].mxu1 }
 0x1d5   :  { %v181_v31 = vadd.f32 %v180_v30, %v131_v29  ;;  %v308_v32 = vpop.f32.mrb[1].mxu1 }
 0x1d6   :  { %v183_v34 = vpop.f32.mrb[2].mxu1 }
 0x1d7   :  { %v184_v35 = vadd.f32 %v183_v34, %v136_v33  ;;  %v309_v36 = vpop.f32.mrb[3].mxu1  ;;  %v187_v37 = vmax.f32 %v181_v31, 0.0 }
 0x1d9   :  { %v188_v38 = vmax.f32 %v184_v35, 0.0 }
 0x1db   :  { %v189_v39 = vpack.c.bf16 %v188_v38, %v187_v37 }
 0x1dd   :  { %v201_v41 = vsel %vm199_vm4, %v189_v39, 0 }
 0x1de   :  { %311 = vmatpush3.bf16.msra.mxu0 %v201_v41 }
 0x1e1   :  { %313 = vmatmul.mubr.msk.bf16.vlgmr.msra.gmra.mrb[4].mxu0 %vm195_vm5, %v40_v40 }
 0x2b4   :  { %v237_v43 = vpop.f32.mrb[4].mxu0 }
 0x2b5   :  { %v238_v44 = vadd.f32 %v237_v43, %v193_v42  ;;  %v314_v45 = vpop.f32.mrb[5].mxu0 }
 0x2b6   :  { %v240_v46 = vpop.f32.mrb[6].mxu0 }
 0x2b7   :  { %v244_v47 = vsel %vm243_vm6, %v238_v44, -inf  ;;  %v315_v48 = vpop.f32.mrb[7].mxu0 }
 0x2b8   :  { %v245_v49 = vrot.slane %v244_v47, 4 }
 0x2ba   :  { %v246_v50 = vmax.f32 %v244_v47, %v245_v49 }
 0x2bc   :  { %v247_v51 = vrot.slane %v246_v50, 2 }
 0x2be   :  { %v248_v52 = vmax.f32 %v246_v50, %v247_v51 }
 0x2c0   :  { %v249_v53 = vrot.slane %v248_v52, 1 }
 0x2c2   :  { %v250_v54 = vmax.f32 %v248_v52, %v249_v53 }
 0x2c4   :  { %v251_v55 = vsub.f32 %v238_v44, %v250_v54 }
 0x2c6   :  { %v252_v56 = vmul.f32 1.442695, %v251_v55 }
 0x2c8   :  { %327 = vpow2.f32 %v252_v56 }
 0x2d2   :  { %v328_v57 = vpop.eup %327 }
 0x2d3   :  { %v254_v58 = vsel %vm243_vm6, %v328_v57, 0.0 }
 0x2d4   :  { %v255_v59 = vrot.slane %v254_v58, 4 }
 0x2d6   :  { %v256_v60 = vadd.f32 %v255_v59, %v254_v58 }
 0x2d8   :  { %v257_v61 = vrot.slane %v256_v60, 2 }
 0x2da   :  { %v258_v62 = vadd.f32 %v257_v61, %v256_v60 }
 0x2dc   :  { %v259_v63 = vrot.slane %v258_v62, 1 }
 0x2de   :  { %v260_v0 = vadd.f32 %v259_v63, %v258_v62 }
 0x2e0   :  { %329 = vrcp.f32 %v260_v0 }
 0x2ea   :  { %v330_v1 = vpop.eup %329 }
 0x2eb   :  { %v262_v2 = vmul.f32 %v330_v1, %v328_v57 }
 0x2ed   :  { %263 = vst.msk [vmem:[#allocation5] sm:$0xf] %vm243_vm6, %v262_v2 }
 0x2ee   :  { %364 = shalt.err (!%p361_p12)
}
 0x2ef   :  { %s365_s30 = scalar_lea.hbm %s438_s2, 64 }
 0x2f0   :  { %p366_p13 = scmp.ne.s32.totalorder %s438_s2, %s365_s30  ;;  %p369_p0 = scmp.lt.u32.totalorder %s365_s30, %s438_s2 }
 0x2f2   :  { %p371_p1 = pnand %p369_p0, %p366_p13 }
 0x2f4   :  { %374 = shalt.err (!%p371_p1)
}
 0x2f5   :  { %273 = dma.vmem_to_hbm [thread:$0]  %s271_s1, 64, %s438_s2, [#allocation4]  }
 0x2f6   :  { %377 = dma.done.wait [#allocation4], 64  }
 0x2f7   :  { %378 = vsyncadd [#allocation4], 4294967232 }
 0x2f8   :  { %277 = vsyncpa [#allocation3], 1 }
 0x2f9   :  { %278 = vsyncpa [#allocation4], 1 }

</bundles_post_ra>
